<compile_context>
chip_gen: v5e
topology: v5e:2x2
jax: 0.10.0
libtpu: 0.0.40
codegen_flags: <defaults>
</compile_context>

<pallas_src>
import functools

import jax
import jax.numpy as jnp
from jax.experimental import pallas as pl
from jax.experimental.pallas import tpu as pltpu


def _bpr_partial_kernel(pos_ref, neg_ref, out_ref, *, tile_b, batch, need_mask):
    x = pos_ref[...].astype(jnp.float32) - neg_ref[...].astype(jnp.float32)
    # -logsigmoid(x) == softplus(-x) = max(-x, 0) + log1p(exp(-|x|))   (stable form)
    loss = jnp.maximum(-x, 0.0) + jnp.log1p(jnp.exp(-jnp.abs(x)))
    if need_mask:
        # Zero contributions from rows past the true batch size (ragged tail block).
        row = pl.program_id(0) * tile_b + jax.lax.broadcasted_iota(
            jnp.int32, loss.shape, 0
        )
        loss = jnp.where(row < batch, loss, 0.0)
    # Reduce (tile_b, NI) -> (8, NI): the reshape groups exact sublane-groups, so the
    # sum over axis 0 is pure VPU vreg adds that hide under the streaming DMA.
    out_ref[...] = loss.reshape(tile_b // 8, 8, loss.shape[-1]).sum(axis=0)


def bpr_loss(pos_scores: jax.Array, neg_scores: jax.Array, *, block_rows=None):
    assert pos_scores.shape == neg_scores.shape
    # Canonical 2-D (batch, num_items) view; contiguous reshape is metadata-only
    # (no extra HBM pass in the wrapper).
    if pos_scores.ndim <= 1:
        pos2 = pos_scores.reshape(1, -1)
        neg2 = neg_scores.reshape(1, -1)
    else:
        pos2 = pos_scores.reshape(-1, pos_scores.shape[-1])
        neg2 = neg_scores.reshape(-1, neg_scores.shape[-1])
    batch, ni = pos2.shape
    total = batch * ni
    itemsize = jnp.dtype(pos2.dtype).itemsize

    # ~2 MiB per input block (measured streaming sweet spot), rows a multiple of 8,
    # never larger than the 8-rounded batch.  Assumes a single row (8*ni*itemsize)
    # fits VMEM comfortably, which holds for realistic num_items.
    if block_rows is None:
        target_rows = max(8, ((2 * 1024 * 1024) // max(ni * itemsize, 1)) // 8 * 8)
    else:
        target_rows = max(8, (block_rows // 8) * 8)
    tile_b = min(target_rows, ((batch + 7) // 8) * 8)

    num_blocks = pl.cdiv(batch, tile_b)
    need_mask = (batch % tile_b) != 0

    kernel = functools.partial(
        _bpr_partial_kernel, tile_b=tile_b, batch=batch, need_mask=need_mask
    )

    partials = pl.pallas_call(
        kernel,
        out_shape=jax.ShapeDtypeStruct((num_blocks * 8, ni), jnp.float32),
        grid=(num_blocks,),
        in_specs=[
            pl.BlockSpec((tile_b, ni), lambda i: (i, 0)),
            pl.BlockSpec((tile_b, ni), lambda i: (i, 0)),
        ],
        out_specs=pl.BlockSpec((8, ni), lambda i: (i, 0)),
        compiler_params=pltpu.CompilerParams(
            dimension_semantics=("parallel",),  # shards batch tiles across v7x's 2 TCs
        ),
        cost_estimate=pl.CostEstimate(
            flops=6 * total,
            transcendentals=2 * total,  # exp + log1p per element
            bytes_accessed=2 * total * itemsize + num_blocks * 8 * ni * 4,
        ),
    )(pos2, neg2)

    # Single cross-lane reduction over the tiny partial-sum array; divide by the
    # TRUE element count (masked tail rows contributed exactly 0).
    return jnp.sum(partials) / total


if __name__ == "__main__":
    key = jax.random.PRNGKey(0)
    k1, k2 = jax.random.split(key)

    def _ref(p, n):
        x = p - n
        return jnp.mean(jnp.maximum(-x, 0.0) + jnp.log1p(jnp.exp(-jnp.abs(x))))

    # Case 1: small, tile-friendly shapes (batch=8, num_items=128), single block.
    pos_scores = jax.random.normal(k1, (8, 128), dtype=jnp.float32)
    neg_scores = jax.random.normal(k2, (8, 128), dtype=jnp.float32)
    loss = bpr_loss(pos_scores, neg_scores)
    jax.block_until_ready(loss)
    assert jnp.allclose(loss, _ref(pos_scores, neg_scores), rtol=1e-5, atol=1e-6), (
        loss,
        _ref(pos_scores, neg_scores),
    )

    # Case 2: ragged batch + multiple grid steps (exercises masking & pipelining).
    k3, k4 = jax.random.split(k2)
    pos_r = jax.random.normal(k3, (50, 384), dtype=jnp.float32)
    neg_r = jax.random.normal(k4, (50, 384), dtype=jnp.float32)
    loss_r = bpr_loss(pos_r, neg_r, block_rows=16)  # grid=4, tail block masked
    jax.block_until_ready(loss_r)
    assert jnp.allclose(loss_r, _ref(pos_r, neg_r), rtol=1e-5, atol=1e-5), (
        loss_r,
        _ref(pos_r, neg_r),
    )

    print("KERNEL_OK")
</pallas_src>

<mosaic_0001>
module attributes {stable_mosaic.version = 11 : i64} {
  func.func @_bpr_partial_kernel(%arg0: i32, %arg1: memref<8x128xf32, #tpu.memory_space<vmem>>, %arg2: memref<8x128xf32, #tpu.memory_space<vmem>>, %arg3: memref<8x128xf32, #tpu.memory_space<vmem>>) attributes {dimension_semantics = [#tpu.dimension_semantics<parallel>], iteration_bounds = array<i64: 1>, scalar_prefetch = 0 : i64, scratch_operands = 0 : i64, tpu.core_type = #tpu.core_type<tc>, window_params = [{transform_indices = @transform_0, window_bounds = array<i64: 8, 128>}, {transform_indices = @transform_1, window_bounds = array<i64: 8, 128>}, {transform_indices = @transform_2, window_bounds = array<i64: 8, 128>}]} {
    %c0 = arith.constant 0 : index
    %c0_0 = arith.constant 0 : index
    %0 = vector.load %arg1[%c0, %c0_0] : memref<8x128xf32, #tpu.memory_space<vmem>>, vector<8x128xf32>
    %c0_1 = arith.constant 0 : index
    %c0_2 = arith.constant 0 : index
    %1 = vector.load %arg2[%c0_1, %c0_2] : memref<8x128xf32, #tpu.memory_space<vmem>>, vector<8x128xf32>
    %2 = arith.subf %0, %1 : vector<8x128xf32>
    %cst = arith.constant 0.000000e+00 : f32
    %3 = vector.broadcast %cst : f32 to vector<8x128xf32>
    %4 = arith.subf %3, %2 : vector<8x128xf32>
    %cst_3 = arith.constant 0.000000e+00 : f32
    %5 = vector.broadcast %cst_3 : f32 to vector<8x128xf32>
    %6 = arith.maximumf %4, %5 : vector<8x128xf32>
    %7 = math.absf %2 : vector<8x128xf32>
    %cst_4 = arith.constant 0.000000e+00 : f32
    %8 = vector.broadcast %cst_4 : f32 to vector<8x128xf32>
    %9 = arith.subf %8, %7 : vector<8x128xf32>
    %10 = math.exp %9 : vector<8x128xf32>
    %11 = math.log1p %10 : vector<8x128xf32>
    %12 = arith.addf %6, %11 : vector<8x128xf32>
    %13 = vector.shape_cast %12 : vector<8x128xf32> to vector<1x8x128xf32>
    %cst_5 = arith.constant dense<0.000000e+00> : vector<8x128xf32>
    %14 = vector.multi_reduction <add>, %13, %cst_5 [0] : vector<1x8x128xf32> to vector<8x128xf32>
    %c0_6 = arith.constant 0 : index
    %c0_7 = arith.constant 0 : index
    %15 = vector.load %arg3[%c0_6, %c0_7] : memref<8x128xf32, #tpu.memory_space<vmem>>, vector<8x128xf32>
    tpu.vector_store %arg3[%c0_6, %c0_7], %14 {strides = array<i32>} : memref<8x128xf32, #tpu.memory_space<vmem>>, vector<8x128xf32>,
    return
  }
  func.func @transform_0(%arg0: i32) -> (i32, i32) {
    %c0_i32 = arith.constant 0 : i32
    %c0_i32_0 = arith.constant 0 : i32
    return %arg0, %c0_i32 : i32, i32
  }
  func.func @transform_1(%arg0: i32) -> (i32, i32) {
    %c0_i32 = arith.constant 0 : i32
    %c0_i32_0 = arith.constant 0 : i32
    return %arg0, %c0_i32 : i32, i32
  }
  func.func @transform_2(%arg0: i32) -> (i32, i32) {
    %c0_i32 = arith.constant 0 : i32
    %c0_i32_0 = arith.constant 0 : i32
    return %arg0, %c0_i32 : i32, i32
  }
}

</mosaic_0001>

<bundles_post_ra>
// kernel: tpu_custom_call.1
= control target key start
LH: loop header
LB: loop body
LE: loop exit
PB: predicated region body
PF: predicated region fallthrough
CT: control target
= control target key end

     0   :  { %7 = vsyncpa [#allocation3], 0  ;;  %s191_s0 = inlined_call_operand.hbm [shape: f32[8,128], index: 0, kind: input, shape index: {}]   ;;  %s192_s1 = inlined_call_operand.hbm [shape: f32[8,128], index: 1, kind: input, shape index: {}]   ;;  %s193_s2 = inlined_call_operand.hbm [shape: f32[8,128], index: 2, kind: output, shape index: {}]  }
   0x1   :  { %8 = vsyncpa [#allocation6], 0 }
   0x2   :  { %9 = vsyncpa [#allocation4], 0  ;;  %s15_s11 = sshll.u32 %s191_s0, 4  ;;  %s164_s12 = smov [#allocation2]   ;;  %s16_s11 = int_to_ptr.hbm [resolvable:$true] %s15_s11 }
   0x3   :  { %s17_s13 = sshll.u32 %s164_s12, 4  ;;  %s26_s16 = sshll.u32 %s192_s1, 4  ;;  %s18_s13 = int_to_ptr.vmem [resolvable:$true] %s17_s13  ;;  %s27_s16 = int_to_ptr.hbm [resolvable:$true] %s26_s16 }
   0x4   :  { %20 = dma.hbm_to_vmem [thread:$0]  %s16_s11, 128, %s18_s13, [#allocation3]  }
   0x5   :  { %s165_s17 = smov [#allocation5]  }
   0x6   :  { %s28_s18 = sshll.u32 %s165_s17, 4  ;;  %s29_s18 = int_to_ptr.vmem [resolvable:$true] %s28_s18 }
   0x7   :  { %31 = dma.hbm_to_vmem [thread:$0]  %s27_s16, 128, %s29_s18, [#allocation6]  }
   0x8   :  { %158 = dma.done.wait [#allocation3], 128  }
   0x9   :  { %159 = vsyncadd [#allocation3], 4294967168 }
   0xa   :  { %160 = dma.done.wait [#allocation6], 128  }
   0xb   :  { %161 = vsyncadd [#allocation6], 4294967168  ;;  %v40_v0 = vld [vmem:[#allocation2] sm:$0xff]  ;;  %v41_v1 = vld [vmem:[#allocation5] sm:$0xff]  ;;  %s166_s0 = smov [#allocation7]   ;;  %s68_s21 = sshll.u32 %s193_s2, 4  ;;  %s69_s21 = int_to_ptr.hbm [resolvable:$true] %s68_s21 }
   0xc   :  { %v42_v2 = vsub.f32 %v40_v0, %v41_v1  ;;  %s66_s1 = sshll.u32 %s166_s0, 4  ;;  %s67_s1 = int_to_ptr.vmem [resolvable:$true] %s66_s1 }
   0xe   :  { %v45_v3 = vand.u32 2147483647, %v42_v2  ;;  %v43_v10 = vsub.f32 0.0, %v42_v2 }
  0x10   :  { %v46_v4 = vsub.f32 0.0, %v45_v3  ;;  %v44_v14 = vmax.f32 %v43_v10, 0.0 }
  0x12   :  { %v47_v5 = vmul.f32 1.442695, %v46_v4 }
  0x14   :  { %82 = vpow2.f32 %v47_v5 }
  0x1a   :  { %v83_v6 = vpop.eup %82 }
  0x1b   :  { %v49_v7 = vadd.f32 1.0, %v83_v6  ;;  %v52_v8 = vmul.f32 -0.5, %v83_v6  ;;  %v55_v11 = vand.u32 2147483647, %v83_v6 }
  0x1d   :  { %84 = vlog2.f32 %v49_v7  ;;  %v53_v9 = vadd.f32 1.0, %v52_v8  ;;  %vm56_vm0 = vcmp.lt.f32.partialorder %v55_v11, 0.0004427343 }
  0x1f   :  { %v54_v12 = vmul.f32 %v83_v6, %v53_v9 }
  0x23   :  { %v85_v13 = vpop.eup %84 }
  0x24   :  { %v51_v15 = vmul.f32 0.6931472, %v85_v13 }
  0x26   :  { %v57_v16 = vsel %vm56_vm0, %v54_v12, %v51_v15 }
  0x27   :  { %v58_v17 = vadd.f32 %v57_v16, %v44_v14 }
  0x29   :  { %60 = vst [vmem:[#allocation7] sm:$0xff] %v58_v17 }
  0x2a   :  { %71 = dma.vmem_to_hbm [thread:$0]  %s67_s1, 128, %s69_s21, [#allocation4]  }
  0x2b   :  { %162 = dma.done.wait [#allocation4], 128  }
  0x2c   :  { %163 = vsyncadd [#allocation4], 4294967168 }
  0x2d   :  { %76 = vsyncpa [#allocation3], 1 }
  0x2e   :  { %77 = vsyncpa [#allocation6], 1 }
  0x2f   :  { %78 = vsyncpa [#allocation4], 1 }

</bundles_post_ra>
